<compile_context>
chip_gen: v7x
topology: tpu7x:2x2x1
jax: 0.10.0
libtpu: 0.0.40
codegen_flags: <defaults>
</compile_context>

<pallas_src>
import functools
import math

import jax
import jax.numpy as jnp
from jax.experimental import pallas as pl
from jax.experimental.pallas import tpu as pltpu


def _round_up(x: int, m: int) -> int:
    return ((x + m - 1) // m) * m


def _vmem_budget_and_cap():
    """Generation-aware (budget, vmem_limit cap) in bytes."""
    cap = 128 << 20
    try:
        info = pltpu.get_tpu_info()
        c = getattr(info, "vmem_capacity_bytes", None)
        if c:
            cap = int(c)
    except Exception:
        pass
    if cap <= (64 << 20):          # v7x-class: 64 MiB per TensorCore
        return 40 << 20, 52 << 20
    return 96 << 20, 110 << 20     # v5e / v6e: 128 MiB per TensorCore


def _proj_logsumexp_kernel(x_ref, w_ref, b_ref, o_ref, lse_ref, m_ref, l_ref, *,
                           fused):
    """One (row tile, class tile) step: logits + online logsumexp.

    x_ref   : (TM, Hp) bf16  -- resident across the class axis j
    w_ref   : (Hp, TC) bf16  -- streamed per class tile
    b_ref   : (1,  TC) f32   -- padded classes carry a -inf bias
    o_ref   : (TM, TC) f32   -- streamed raw logits (log-probs if fused)
    lse_ref : (TM, 1)  f32   -- resident across j, written on the last tile
    m_ref/l_ref : (TM,1) f32 running max / running sum-of-exp scratch
    """
    j = pl.program_id(1)
    nj = pl.num_programs(1)

    @pl.when(j == 0)
    def _():
        m_ref[...] = jnp.full_like(m_ref, -jnp.inf)
        l_ref[...] = jnp.zeros_like(l_ref)

    # MXU matmul with f32 accumulation; bias add + softmax stats in f32.
    logits = jnp.dot(x_ref[...], w_ref[...],
                     preferred_element_type=jnp.float32) + b_ref[...]

    m_prev = m_ref[...]
    m_new = jnp.maximum(m_prev, jnp.max(logits, axis=-1, keepdims=True))
    alpha = jnp.exp(m_prev - m_new)
    l_new = alpha * l_ref[...] + jnp.sum(jnp.exp(logits - m_new),
                                         axis=-1, keepdims=True)
    l_ref[...] = l_new
    m_ref[...] = m_new

    if fused:
        # Single class tile: logsumexp is already complete -> write log-probs.
        lse = m_new + jnp.log(l_new)
        o_ref[...] = logits - lse
        lse_ref[...] = lse
    else:
        # Stream raw logits; the normalize pass subtracts lse afterwards.
        o_ref[...] = logits

        @pl.when(j == nj - 1)
        def _():
            lse_ref[...] = m_ref[...] + jnp.log(l_ref[...])


def _normalize_kernel(logits_ref, lse_ref, o_ref):
    # log_probs = logits - lse  (lane-dense streamed blocks, in-place via alias)
    o_ref[...] = logits_ref[...] - lse_ref[...]


def make_softmax_output_layer(weight_t, bias, *, tile_m=512, tile_c=2048,
                              compute_dtype=jnp.bfloat16,
                              out_dtype=jnp.float32):
    """Build a jitted forward(x) computing log_softmax(x @ weight_t + bias, -1).

    weight_t: (H, C) -- transpose of nn.Linear's (C, H) weight (done once here).
    bias: (C,).  Parameter padding/casting is hoisted out of the per-call path.
    """
    H, C = weight_t.shape
    assert bias.shape == (C,)

    budget, vmem_cap = _vmem_budget_and_cap()
    in_size = jnp.dtype(compute_dtype).itemsize

    # --- H alignment for the MXU contraction dim (256 for v6e/v7x; cheap skip
    #     for small H where relative padding overhead would dominate).
    if H >= 256:
        H_pad = _round_up(H, 256)
    elif H >= 8:
        H_pad = _round_up(H, 8)
    else:
        H_pad = H

    # --- class tile: 128-aligned; shrink if the weight double-buffer alone
    #     would blow the budget; then balance against C to minimize padding.
    C_pad128 = _round_up(C, 128)
    tc = min(_round_up(tile_c, 128), C_pad128)
    while 2 * H_pad * tc * in_size > budget // 2 and tc > 128:
        tc = max(128, _round_up(tc // 2, 128))
    nj = pl.cdiv(C_pad128, tc)
    tc = _round_up(pl.cdiv(C_pad128, nj), 128)   # never increases tc
    nj = pl.cdiv(C_pad128, tc)
    C_pad = nj * tc
    fused = (nj == 1)

    # --- parameter prep, executed ONCE (hoisted out of the per-call path).
    w_p = jnp.pad(jnp.asarray(weight_t),
                  ((0, H_pad - H), (0, C_pad - C))).astype(compute_dtype)
    # Padded classes: -inf bias -> -inf logits -> exp()=0, harmless to logsumexp.
    b_p = jnp.pad(jnp.asarray(bias).astype(jnp.float32), (0, C_pad - C),
                  constant_values=-jnp.inf).reshape(1, C_pad)

    kernel = functools.partial(_proj_logsumexp_kernel, fused=fused)

    def footprint(tm_):
        # Double-buffered pipeline stages for inputs/outputs + scratch.
        return (2 * (tm_ * H_pad * in_size     # x row tile
                     + H_pad * tc * in_size    # weight class tile
                     + tc * 4                  # bias class tile
                     + tm_ * tc * 4            # streamed logits block
                     + tm_ * 4)                # lse block
                + 2 * tm_ * 4)                 # running max / sum scratch

    def forward(x):
        lead = x.shape[:-1]
        assert x.shape[-1] == H, "hidden size mismatch"
        M = int(math.prod(lead)) if lead else 1

        # Row tile: big, 128-aligned, shrunk only until the working set fits.
        tm = max(128, min(_round_up(tile_m, 128), _round_up(M, 128)))
        while footprint(tm) > budget and tm > 128:
            tm = max(128, _round_up(tm // 2, 128))
        M_pad = _round_up(M, tm)

        x2d = jnp.pad(x.reshape(M, H).astype(compute_dtype),
                      ((0, M_pad - M), (0, H_pad - H)))

        vmem1 = int(min(vmem_cap, max(16 << 20, int(1.5 * footprint(tm)))))

        logits, lse = pl.pallas_call(
            kernel,
            out_shape=(jax.ShapeDtypeStruct((M_pad, C_pad), jnp.float32),
                       jax.ShapeDtypeStruct((M_pad, 1), jnp.float32)),
            grid_spec=pltpu.PrefetchScalarGridSpec(
                num_scalar_prefetch=0,
                grid=(M_pad // tm, nj),
                in_specs=[
                    pl.BlockSpec((tm, H_pad), lambda i, j: (i, 0)),  # x rows
                    pl.BlockSpec((H_pad, tc), lambda i, j: (0, j)),  # weight
                    pl.BlockSpec((1, tc), lambda i, j: (0, j)),      # bias
                ],
                out_specs=[
                    pl.BlockSpec((tm, tc), lambda i, j: (i, j)),     # logits
                    pl.BlockSpec((tm, 1), lambda i, j: (i, 0)),      # lse
                ],
                scratch_shapes=[pltpu.VMEM((tm, 1), jnp.float32),    # running max
                                pltpu.VMEM((tm, 1), jnp.float32)],   # running sum
            ),
            compiler_params=pltpu.CompilerParams(
                dimension_semantics=("parallel", "arbitrary"),
                vmem_limit_bytes=vmem1,
            ),
        )(x2d, w_p, b_p)

        if fused:
            out = logits  # already normalized in-kernel
        else:
            vmem2 = int(min(vmem_cap, max(16 << 20, 6 * tm * tc * 4)))
            out = pl.pallas_call(
                _normalize_kernel,
                out_shape=jax.ShapeDtypeStruct((M_pad, C_pad), jnp.float32),
                grid=(M_pad // tm, nj),
                in_specs=[pl.BlockSpec((tm, tc), lambda i, j: (i, j)),
                          pl.BlockSpec((tm, 1), lambda i, j: (i, 0))],
                out_specs=pl.BlockSpec((tm, tc), lambda i, j: (i, j)),
                input_output_aliases={0: 0},   # normalize in place
                compiler_params=pltpu.CompilerParams(
                    dimension_semantics=("parallel", "parallel"),
                    vmem_limit_bytes=vmem2,
                ),
            )(logits, lse)

        out = out[:M, :C].astype(out_dtype)
        return out.reshape(*lead, C)

    return jax.jit(forward)


if __name__ == "__main__":
    key = jax.random.PRNGKey(0)

    # ---- Test 1: small shapes from the module spec (single class tile path).
    batch, seq, hidden, n_classes = 2, 8, 32, 10
    kx, kw, kb, k2 = jax.random.split(key, 4)

    # Deterministic init mimicking nn.Linear: U(-1/sqrt(H), 1/sqrt(H)).
    bound = 1.0 / (hidden ** 0.5)
    # PyTorch weight is (C, H); we keep the transpose (H, C) for the matmul.
    weight_t = jax.random.uniform(kw, (hidden, n_classes), jnp.float32,
                                  minval=-bound, maxval=bound)
    bias = jax.random.uniform(kb, (n_classes,), jnp.float32,
                              minval=-bound, maxval=bound)
    x = jax.random.normal(kx, (batch, seq, hidden), jnp.float32)

    layer = make_softmax_output_layer(weight_t, bias)
    log_probs = layer(x)
    jax.block_until_ready(log_probs)
    assert log_probs.shape == (batch, seq, n_classes)

    logits_bf16 = jnp.dot(x.astype(jnp.bfloat16), weight_t.astype(jnp.bfloat16),
                          preferred_element_type=jnp.float32) + bias
    ref_bf16 = jax.nn.log_softmax(logits_bf16, axis=-1)
    assert jnp.allclose(log_probs, ref_bf16, atol=2e-3, rtol=2e-3)
    ref_f32 = jax.nn.log_softmax(x @ weight_t + bias, axis=-1)
    assert jnp.allclose(log_probs, ref_f32, atol=5e-2, rtol=5e-2)

    # ---- Test 2: class axis spanning several tiles (exercises the streamed
    #      logits + lse outputs and the aliased in-place normalize pass).
    hidden2, classes2 = 64, 300
    k2x, k2w, k2b = jax.random.split(k2, 3)
    bound2 = 1.0 / (hidden2 ** 0.5)
    weight2 = jax.random.uniform(k2w, (hidden2, classes2), jnp.float32,
                                 minval=-bound2, maxval=bound2)
    bias2 = jax.random.uniform(k2b, (classes2,), jnp.float32,
                               minval=-bound2, maxval=bound2)
    x2 = jax.random.normal(k2x, (batch, seq, hidden2), jnp.float32)

    layer2 = make_softmax_output_layer(weight2, bias2, tile_c=128)
    log_probs2 = layer2(x2)
    jax.block_until_ready(log_probs2)
    assert log_probs2.shape == (batch, seq, classes2)

    logits2_bf16 = jnp.dot(x2.astype(jnp.bfloat16), weight2.astype(jnp.bfloat16),
                           preferred_element_type=jnp.float32) + bias2
    ref2_bf16 = jax.nn.log_softmax(logits2_bf16, axis=-1)
    assert jnp.allclose(log_probs2, ref2_bf16, atol=2e-3, rtol=2e-3)
    ref2_f32 = jax.nn.log_softmax(x2 @ weight2 + bias2, axis=-1)
    assert jnp.allclose(log_probs2, ref2_f32, atol=5e-2, rtol=5e-2)

    print("KERNEL_OK")
</pallas_src>

<mosaic_0001>
module attributes {stable_mosaic.version = 11 : i64} {
  func.func @_proj_logsumexp_kernel(%arg0: i32, %arg1: i32, %arg2: memref<128x32xbf16, #tpu.memory_space<vmem>>, %arg3: memref<32x128xbf16, #tpu.memory_space<vmem>>, %arg4: memref<1x128xf32, #tpu.memory_space<vmem>>, %arg5: memref<128x128xf32, #tpu.memory_space<vmem>>, %arg6: memref<128x1xf32, #tpu.memory_space<vmem>>, %arg7: memref<128x1xf32, #tpu.memory_space<vmem>>, %arg8: memref<128x1xf32, #tpu.memory_space<vmem>>) attributes {dimension_semantics = [#tpu.dimension_semantics<parallel>, #tpu.dimension_semantics<arbitrary>], iteration_bounds = array<i64: 1, 1>, scalar_prefetch = 0 : i64, scratch_operands = 2 : i64, tpu.core_type = #tpu.core_type<tc>, window_params = [{transform_indices = @transform_0, window_bounds = array<i64: 128, 32>}, {transform_indices = @transform_1, window_bounds = array<i64: 32, 128>}, {transform_indices = @transform_2, window_bounds = array<i64: 1, 128>}, {transform_indices = @transform_3, window_bounds = array<i64: 128, 128>}, {transform_indices = @transform_4, window_bounds = array<i64: 128, 1>}]} {
    %c0_i32 = arith.constant 0 : i32
    %0 = arith.cmpi eq, %arg1, %c0_i32 : i32
    %1 = arith.extui %0 : i1 to i32
    %c0_i32_0 = arith.constant 0 : i32
    %2 = arith.cmpi ne, %1, %c0_i32_0 : i32
    scf.if %2 {
      %cst_20 = arith.constant 0xFF800000 : f32
      %31 = vector.broadcast %cst_20 : f32 to vector<128x1xf32>
      %c0_21 = arith.constant 0 : index
      %c0_22 = arith.constant 0 : index
      %32 = vector.load %arg7[%c0_21, %c0_22] : memref<128x1xf32, #tpu.memory_space<vmem>>, vector<128x1xf32>
      tpu.vector_store %arg7[%c0_21, %c0_22], %31 {strides = array<i32>} : memref<128x1xf32, #tpu.memory_space<vmem>>, vector<128x1xf32>,
      %cst_23 = arith.constant 0.000000e+00 : f32
      %33 = vector.broadcast %cst_23 : f32 to vector<128x1xf32>
      %c0_24 = arith.constant 0 : index
      %c0_25 = arith.constant 0 : index
      %34 = vector.load %arg8[%c0_24, %c0_25] : memref<128x1xf32, #tpu.memory_space<vmem>>, vector<128x1xf32>
      tpu.vector_store %arg8[%c0_24, %c0_25], %33 {strides = array<i32>} : memref<128x1xf32, #tpu.memory_space<vmem>>, vector<128x1xf32>,
    } else {
    }
    %c0 = arith.constant 0 : index
    %c0_1 = arith.constant 0 : index
    %3 = vector.load %arg2[%c0, %c0_1] : memref<128x32xbf16, #tpu.memory_space<vmem>>, vector<128x32xbf16>
    %c0_2 = arith.constant 0 : index
    %c0_3 = arith.constant 0 : index
    %4 = vector.load %arg3[%c0_2, %c0_3] : memref<32x128xbf16, #tpu.memory_space<vmem>>, vector<32x128xbf16>
    %cst = arith.constant dense<0.000000e+00> : vector<128x128xf32>
    %5 = tpu.matmul %3, %4, %cst {dimension_numbers = #tpu.dot_dimension_numbers<[1], [0], [0], [1], [0, 0, 1, 1], [], []>} : vector<128x32xbf16>, vector<32x128xbf16>, vector<128x128xf32> -> vector<128x128xf32>
    %c0_4 = arith.constant 0 : index
    %c0_5 = arith.constant 0 : index
    %6 = vector.load %arg4[%c0_4, %c0_5] : memref<1x128xf32, #tpu.memory_space<vmem>>, vector<1x128xf32>
    %7 = vector.broadcast %6 : vector<1x128xf32> to vector<128x128xf32>
    %8 = arith.addf %5, %7 : vector<128x128xf32>
    %c0_6 = arith.constant 0 : index
    %c0_7 = arith.constant 0 : index
    %9 = vector.load %arg7[%c0_6, %c0_7] : memref<128x1xf32, #tpu.memory_space<vmem>>, vector<128x1xf32>
    %cst_8 = arith.constant dense<0xFF800000> : vector<128xf32>
    %10 = vector.multi_reduction <maximumf>, %8, %cst_8 [1] : vector<128x128xf32> to vector<128xf32>
    %11 = vector.shape_cast %10 : vector<128xf32> to vector<128x1xf32>
    %12 = arith.maximumf %9, %11 : vector<128x1xf32>
    %13 = arith.subf %9, %12 : vector<128x1xf32>
    %14 = math.exp %13 : vector<128x1xf32>
    %c0_9 = arith.constant 0 : index
    %c0_10 = arith.constant 0 : index
    %15 = vector.load %arg8[%c0_9, %c0_10] : memref<128x1xf32, #tpu.memory_space<vmem>>, vector<128x1xf32>
    %16 = arith.mulf %14, %15 : vector<128x1xf32>
    %17 = vector.broadcast %12 : vector<128x1xf32> to vector<128x128xf32>
    %18 = arith.subf %8, %17 : vector<128x128xf32>
    %19 = math.exp %18 : vector<128x128xf32>
    %cst_11 = arith.constant dense<0.000000e+00> : vector<128xf32>
    %20 = vector.multi_reduction <add>, %19, %cst_11 [1] : vector<128x128xf32> to vector<128xf32>
    %21 = vector.shape_cast %20 : vector<128xf32> to vector<128x1xf32>
    %22 = arith.addf %16, %21 : vector<128x1xf32>
    %c0_12 = arith.constant 0 : index
    %c0_13 = arith.constant 0 : index
    %23 = vector.load %arg8[%c0_12, %c0_13] : memref<128x1xf32, #tpu.memory_space<vmem>>, vector<128x1xf32>
    tpu.vector_store %arg8[%c0_12, %c0_13], %22 {strides = array<i32>} : memref<128x1xf32, #tpu.memory_space<vmem>>, vector<128x1xf32>,
    %c0_14 = arith.constant 0 : index
    %c0_15 = arith.constant 0 : index
    %24 = vector.load %arg7[%c0_14, %c0_15] : memref<128x1xf32, #tpu.memory_space<vmem>>, vector<128x1xf32>
    tpu.vector_store %arg7[%c0_14, %c0_15], %12 {strides = array<i32>} : memref<128x1xf32, #tpu.memory_space<vmem>>, vector<128x1xf32>,
    %25 = math.log %22 : vector<128x1xf32>
    %26 = arith.addf %12, %25 : vector<128x1xf32>
    %27 = vector.broadcast %26 : vector<128x1xf32> to vector<128x128xf32>
    %28 = arith.subf %8, %27 : vector<128x128xf32>
    %c0_16 = arith.constant 0 : index
    %c0_17 = arith.constant 0 : index
    %29 = vector.load %arg5[%c0_16, %c0_17] : memref<128x128xf32, #tpu.memory_space<vmem>>, vector<128x128xf32>
    tpu.vector_store %arg5[%c0_16, %c0_17], %28 {strides = array<i32>} : memref<128x128xf32, #tpu.memory_space<vmem>>, vector<128x128xf32>,
    %c0_18 = arith.constant 0 : index
    %c0_19 = arith.constant 0 : index
    %30 = vector.load %arg6[%c0_18, %c0_19] : memref<128x1xf32, #tpu.memory_space<vmem>>, vector<128x1xf32>
    tpu.vector_store %arg6[%c0_18, %c0_19], %26 {strides = array<i32>} : memref<128x1xf32, #tpu.memory_space<vmem>>, vector<128x1xf32>,
    return
  }
  func.func @transform_0(%arg0: i32, %arg1: i32) -> (i32, i32) {
    %c0_i32 = arith.constant 0 : i32
    %c0_i32_0 = arith.constant 0 : i32
    return %arg0, %c0_i32 : i32, i32
  }
  func.func @transform_1(%arg0: i32, %arg1: i32) -> (i32, i32) {
    %c0_i32 = arith.constant 0 : i32
    %c0_i32_0 = arith.constant 0 : i32
    return %c0_i32, %arg1 : i32, i32
  }
  func.func @transform_2(%arg0: i32, %arg1: i32) -> (i32, i32) {
    %c0_i32 = arith.constant 0 : i32
    %c0_i32_0 = arith.constant 0 : i32
    return %c0_i32, %arg1 : i32, i32
  }
  func.func @transform_3(%arg0: i32, %arg1: i32) -> (i32, i32) {
    %c0_i32 = arith.constant 0 : i32
    return %arg0, %arg1 : i32, i32
  }
  func.func @transform_4(%arg0: i32, %arg1: i32) -> (i32, i32) {
    %c0_i32 = arith.constant 0 : i32
    %c0_i32_0 = arith.constant 0 : i32
    return %arg0, %c0_i32 : i32, i32
  }
}

</mosaic_0001>

<bundles_post_ra>
// kernel: forward.1
= control target key start
LH: loop header
LB: loop body
LE: loop exit
PB: predicated region body
PF: predicated region fallthrough
CT: control target
= control target key end

     0   :  { %vm134_vm0 = vcmask 261120   ;;  %s1466_s0 = inlined_call_operand.vmem [shape: bf16[128,32], index: 0, kind: input, shape index: {}]   ;;  %s1467_s1 = inlined_call_operand.vmem [shape: bf16[32,128], index: 1, kind: input, shape index: {}]   ;;  %s1468_s2 = inlined_call_operand.vmem [shape: f32[1,128], index: 2, kind: input, shape index: {}]   ;;  %s1469_s3 = inlined_call_operand.vmem [shape: f32[128,128], index: 3, kind: output, shape index: {0}]   ;;  %s1470_s4 = inlined_call_operand.hbm [shape: f32[128,1], index: 4, kind: output, shape index: {1}]  }
   0x1   :  { %v866_v0 = vld [vmem:[%s1467_s1] sm:$0xff]   ;;  %v867_v1 = vld [vmem:[%s1467_s1 + $0x8] sm:$0xff]   ;;  %v872_v6 = vld [vmem:[%s1466_s0 + $0x10] sm:$0xff]  }
   0x2   :  { %834 = vmatprep.subr.bf16.mxu0 %v866_v0  ;;  %854 = vmatprep.subr.bf16.mxu1 %v866_v0  ;;  %v868_v2 = vld [vmem:[%s1466_s0] sm:$0xff]   ;;  %v870_v4 = vld [vmem:[%s1466_s0 + $0x8] sm:$0xff]   ;;  %v874_v7 = vld [vmem:[%s1466_s0 + $0x30] sm:$0xff]  }
   0x3   :  { %835 = vmatpush3.bf16.msra.mxu0 %v866_v0  ;;  %856 = vmatpush3.bf16.msra.mxu1 %v866_v0  ;;  %v869_v3 = vld [vmem:[%s1466_s0 + $0x20] sm:$0xff]   ;;  %v871_v5 = vld [vmem:[%s1466_s0 + $0x28] sm:$0xff]  }
   0x4   :  { %836 = vmatprep.subr.bf16.mxu0 %v867_v1  ;;  %855 = vmatprep.subr.bf16.mxu1 %v867_v1 }
   0x5   :  { %838 = vmatprep.mubr.msk.bf16.mxu0 %vm134_vm0, %v868_v2  ;;  %846 = vmatprep.mubr.msk.bf16.mxu1 %vm134_vm0, %v869_v3 }
   0x7   :  { %837 = vmatpush3.bf16.msra.mxu0 %v867_v1  ;;  %857 = vmatpush3.bf16.msra.mxu1 %v867_v1 }
   0xa   :  { %839 = vmatmul.mubr.msk.bf16.vlgmr.msra.gmra.mrb[0].mxu0 %vm134_vm0, %v870_v4  ;;  %847 = vmatmul.mubr.msk.bf16.vlgmr.msra.gmra.mrb[0].mxu1 %vm134_vm0, %v871_v5 }
   0xb   :  { %10 = vsyncpa [#allocation5], 0  ;;  %842 = vmatprep.mubr.msk.bf16.mxu0 %vm134_vm0, %v872_v6  ;;  %850 = vmatprep.mubr.msk.bf16.mxu1 %vm134_vm0, %v874_v7  ;;  %v873_v8 = vld [vmem:[%s1466_s0 + $0x18] sm:$0xff]   ;;  %v1068_v10 = vld [vmem:[%s1468_s2] ss:$0 sm:$0xff]  ;;  %vm22_vm1 = vcmask 7168  }
   0xc   :  { %v875_v9 = vld [vmem:[%s1466_s0 + $0x38] sm:$0xff]   ;;  %v996_v29 = vmov -inf   ;;  %v997_v40 = vmov 0   ;;  %v998_v45 = vmov 0.0   ;;  %s999_s0 = smov [#allocation4]  }
   0xd   :  { %33 = vst.msk [vmem:[#allocation2 + $0x50] sm:$0xff] %vm22_vm1, %v996_v29  ;;  %23 = vst.msk [vmem:[#allocation2] sm:$0xff] %vm22_vm1, %v996_v29  ;;  %864 = vset.pattern.permute.xlu1 %v997_v40  ;;  %865 = vset.pattern.permute.xlu0 %v997_v40  ;;  %s792_s2 = sshll.u32 %s999_s0, 4  ;;  %s793_s2 = int_to_ptr.vmem [resolvable:$true] %s792_s2 }
   0xe   :  { %24 = vst.msk [vmem:[#allocation2 + $0x8] sm:$0xff] %vm22_vm1, %v996_v29  ;;  %25 = vst.msk [vmem:[#allocation2 + $0x10] sm:$0xff] %vm22_vm1, %v996_v29  ;;  %s972_s10 = scalar_lea.vmem %s793_s2, 2048  ;;  %p977_p1 = scmp.lt.s32.totalorder %s793_s2, %s793_s2 }
   0xf   :  { %26 = vst.msk [vmem:[#allocation2 + $0x18] sm:$0xff] %vm22_vm1, %v996_v29  ;;  %27 = vst.msk [vmem:[#allocation2 + $0x20] sm:$0xff] %vm22_vm1, %v996_v29  ;;  %p973_p0 = scmp.ne.s32.totalorder %s793_s2, %s972_s10  ;;  %p978_p2 = scmp.lt.s32.totalorder %s972_s10, %s972_s10 }
  0x10   :  { %28 = vst.msk [vmem:[#allocation2 + $0x28] sm:$0xff] %vm22_vm1, %v996_v29  ;;  %29 = vst.msk [vmem:[#allocation2 + $0x30] sm:$0xff] %vm22_vm1, %v996_v29 }
  0x11   :  { %30 = vst.msk [vmem:[#allocation2 + $0x38] sm:$0xff] %vm22_vm1, %v996_v29  ;;  %31 = vst.msk [vmem:[#allocation2 + $0x40] sm:$0xff] %vm22_vm1, %v996_v29  ;;  %p979_p3 = por %p978_p2, %p977_p1 }
  0x12   :  { %843 = vmatmul.mubr.msk.bf16.gmra.mrb[4].mxu0 %vm134_vm0, %v873_v8  ;;  %851 = vmatmul.mubr.msk.bf16.gmra.mrb[4].mxu1 %vm134_vm0, %v875_v9  ;;  %32 = vst.msk [vmem:[#allocation2 + $0x48] sm:$0xff] %vm22_vm1, %v996_v29  ;;  %34 = vst.msk [vmem:[#allocation2 + $0x58] sm:$0xff] %vm22_vm1, %v996_v29 }
  0x13   :  { %35 = vst.msk [vmem:[#allocation2 + $0x60] sm:$0xff] %vm22_vm1, %v996_v29  ;;  %36 = vst.msk [vmem:[#allocation2 + $0x68] sm:$0xff] %vm22_vm1, %v996_v29  ;;  %p980_p4 = pnand %p979_p3, %p973_p0 }
  0x14   :  { %37 = vst.msk [vmem:[#allocation2 + $0x70] sm:$0xff] %vm22_vm1, %v996_v29  ;;  %38 = vst.msk [vmem:[#allocation2 + $0x78] sm:$0xff] %vm22_vm1, %v996_v29  ;;  %v1166_v46 = vld [vmem:[#allocation2 + $0x50] sm:$0xff]  ;;  %v1178_v53 = vld [vmem:[#allocation2] sm:$0xff] }
  0x15   :  { %41 = vst.msk [vmem:[#allocation3 + $0x10] sm:$0xff] %vm22_vm1, %v998_v45  ;;  %39 = vst.msk [vmem:[#allocation3] sm:$0xff] %vm22_vm1, %v998_v45  ;;  %v1168_v47 = vld [vmem:[#allocation2 + $0x10] sm:$0xff]  ;;  %v1209_v1 = vld [vmem:[#allocation2 + $0x8] sm:$0xff] }
  0x16   :  { %40 = vst.msk [vmem:[#allocation3 + $0x8] sm:$0xff] %vm22_vm1, %v998_v45  ;;  %42 = vst.msk [vmem:[#allocation3 + $0x18] sm:$0xff] %vm22_vm1, %v998_v45  ;;  %v1176_v52 = vld [vmem:[#allocation2 + $0x18] sm:$0xff] }
  0x17   :  { %43 = vst.msk [vmem:[#allocation3 + $0x20] sm:$0xff] %vm22_vm1, %v998_v45  ;;  %44 = vst.msk [vmem:[#allocation3 + $0x28] sm:$0xff] %vm22_vm1, %v998_v45  ;;  %v1225_v7 = vld [vmem:[#allocation2 + $0x30] sm:$0xff] }
  0x18   :  { %45 = vst.msk [vmem:[#allocation3 + $0x30] sm:$0xff] %vm22_vm1, %v998_v45  ;;  %46 = vst.msk [vmem:[#allocation3 + $0x38] sm:$0xff] %vm22_vm1, %v998_v45  ;;  %v1193_v59 = vld [vmem:[#allocation2 + $0x40] sm:$0xff]  ;;  %v1223_v6 = vld [vmem:[#allocation2 + $0x38] sm:$0xff] }
  0x19   :  { %47 = vst.msk [vmem:[#allocation3 + $0x40] sm:$0xff] %vm22_vm1, %v998_v45  ;;  %48 = vst.msk [vmem:[#allocation3 + $0x48] sm:$0xff] %vm22_vm1, %v998_v45  ;;  %v1191_v58 = vld [vmem:[#allocation2 + $0x58] sm:$0xff]  ;;  %v1207_v0 = vld [vmem:[#allocation2 + $0x48] sm:$0xff] }
  0x1a   :  { %49 = vst.msk [vmem:[#allocation3 + $0x50] sm:$0xff] %vm22_vm1, %v998_v45  ;;  %50 = vst.msk [vmem:[#allocation3 + $0x58] sm:$0xff] %vm22_vm1, %v998_v45 }
  0x1b   :  { %51 = vst.msk [vmem:[#allocation3 + $0x60] sm:$0xff] %vm22_vm1, %v998_v45  ;;  %52 = vst.msk [vmem:[#allocation3 + $0x68] sm:$0xff] %vm22_vm1, %v998_v45 }
  0x1c   :  { %53 = vst.msk [vmem:[#allocation3 + $0x70] sm:$0xff] %vm22_vm1, %v998_v45  ;;  %54 = vst.msk [vmem:[#allocation3 + $0x78] sm:$0xff] %vm22_vm1, %v998_v45 }
  0xdd   :  { %v840_v11 = vpop.f32.mrb[0].mxu0  ;;  %v848_v12 = vpop.f32.mrb[0].mxu1 }
  0xde   :  { %v1071_v13 = vadd.f32 %v840_v11, %v1068_v10  ;;  %v1074_v14 = vadd.f32 %v848_v12, %v1068_v10  ;;  %v193_v15 = vpop.f32.mrb[1].mxu0  ;;  %v225_v16 = vpop.f32.mrb[1].mxu1  ;;  %v1239_v12 = vld [vmem:[#allocation2 + $0x78] sm:$0xff] }
  0xdf   :  { %v841_v17 = vpop.f32.mrb[2].mxu0  ;;  %v849_v18 = vpop.f32.mrb[2].mxu1  ;;  %v1079_v21 = vadd.f32 %v1068_v10, %v193_v15  ;;  %v1087_v25 = vadd.f32 %v1068_v10, %v225_v16  ;;  %v1241_v15 = vld [vmem:[#allocation2 + $0x20] sm:$0xff] }
  0xe0   :  { %292 = vmax.xlane.f32.xlu0 %v1074_v14  ;;  %v228_v19 = vpop.f32.mrb[3].mxu1  ;;  %276 = vmax.xlane.f32.xlu1 %v1071_v13  ;;  %v196_v20 = vpop.f32.mrb[3].mxu0  ;;  %v1082_v22 = vadd.f32 %v841_v17, %v1068_v10  ;;  %v1090_v26 = vadd.f32 %v849_v18, %v1068_v10 }
  0xe1   :  { %v1111_v34 = vadd.f32 %v1068_v10, %v228_v19  ;;  %v1114_v35 = vadd.f32 %v1068_v10, %v196_v20  ;;  %v1254_v20 = vld [vmem:[#allocation2 + $0x28] sm:$0xff] }
  0xe4   :  { %278 = vmax.xlane.f32.xlu1 %v1082_v22  ;;  %272 = vmax.xlane.f32.xlu0 %v1079_v21 }
  0xe5   :  { %v844_v23 = vpop.f32.mrb[4].mxu0  ;;  %v852_v24 = vpop.f32.mrb[4].mxu1 }
  0xe6   :  { %v209_v27 = vpop.f32.mrb[5].mxu0  ;;  %v241_v28 = vpop.f32.mrb[5].mxu1  ;;  %v1117_v36 = vadd.f32 %v844_v23, %v1068_v10  ;;  %v1141_v43 = vadd.f32 %v852_v24, %v1068_v10  ;;  %v1256_v23 = vld [vmem:[#allocation2 + $0x60] sm:$0xff] }
  0xe7   :  { %v845_v30 = vpop.f32.mrb[6].mxu0  ;;  %v853_v31 = vpop.f32.mrb[6].mxu1  ;;  %v1125_v38 = vadd.f32 %v1068_v10, %v209_v27  ;;  %v1133_v41 = vadd.f32 %v1068_v10, %v241_v28 }
  0xe8   :  { %294 = vmax.xlane.f32.xlu1 %v1090_v26  ;;  %288 = vmax.xlane.f32.xlu0 %v1087_v25  ;;  %v212_v32 = vpop.f32.mrb[7].mxu0  ;;  %v244_v33 = vpop.f32.mrb[7].mxu1  ;;  %v1122_v37 = vadd.f32 %v845_v30, %v1068_v10  ;;  %v1130_v39 = vadd.f32 %v853_v31, %v1068_v10  ;;  %v1269_v30 = vld [vmem:[#allocation2 + $0x68] sm:$0xff]  ;;  %v1271_v31 = vld [vmem:[#allocation2 + $0x70] sm:$0xff] }
  0xe9   :  { %v1138_v42 = vadd.f32 %v1068_v10, %v212_v32  ;;  %v1144_v44 = vadd.f32 %v1068_v10, %v244_v33 }
  0xec   :  { %290 = vmax.xlane.f32.xlu1 %v1111_v34  ;;  %274 = vmax.xlane.f32.xlu0 %v1114_v35 }
  0xf0   :  { %286 = vmax.xlane.f32.xlu1 %v1122_v37  ;;  %284 = vmax.xlane.f32.xlu0 %v1117_v36 }
  0xf4   :  { %302 = vmax.xlane.f32.xlu1 %v1130_v39  ;;  %280 = vmax.xlane.f32.xlu0 %v1125_v38 }
  0xf8   :  { %282 = vmax.xlane.f32.xlu1 %v1138_v42  ;;  %296 = vmax.xlane.f32.xlu0 %v1133_v41 }
  0xfc   :  { %298 = vmax.xlane.f32.xlu1 %v1144_v44  ;;  %300 = vmax.xlane.f32.xlu0 %v1141_v43 }
 0x16d   :  { %v293_v48 = vpop.xlane.xlu0 %292  ;;  %v277_v49 = vpop.xlane.xlu1 %276 }
 0x16e   :  { %v1171_v50 = vmax.f32 %v1166_v46, %v293_v48  ;;  %v1174_v51 = vmax.f32 %v1168_v47, %v277_v49 }
 0x170   :  { %603 = vst.msk [vmem:[#allocation2 + $0x50] sm:$0xff] %vm22_vm1, %v1171_v50  ;;  %595 = vst.msk [vmem:[#allocation2 + $0x10] sm:$0xff] %vm22_vm1, %v1174_v51  ;;  %412 = vperm.xlu1 %864, %v1174_v51  }
 0x171   :  { %v279_v54 = vpop.xlane.xlu1 %278  ;;  %v273_v55 = vpop.xlane.xlu0 %272 }
 0x172   :  { %v1186_v56 = vmax.f32 %v1176_v52, %v279_v54  ;;  %v1189_v57 = vmax.f32 %v1178_v53, %v273_v55 }
 0x174   :  { %596 = vst.msk [vmem:[#allocation2 + $0x18] sm:$0xff] %vm22_vm1, %v1186_v56  ;;  %593 = vst.msk [vmem:[#allocation2] sm:$0xff] %vm22_vm1, %v1189_v57  ;;  %452 = vperm.xlu1 %864, %v1171_v50   ;;  %402 = vperm.xlu0 %865, %v1189_v57  }
 0x175   :  { %v295_v60 = vpop.xlane.xlu1 %294  ;;  %v289_v61 = vpop.xlane.xlu0 %288 }
 0x176   :  { %v1202_v62 = vmax.f32 %v1191_v58, %v295_v60  ;;  %v1205_v63 = vmax.f32 %v1193_v59, %v289_v61 }
 0x178   :  { %604 = vst.msk [vmem:[#allocation2 + $0x58] sm:$0xff] %vm22_vm1, %v1202_v62  ;;  %601 = vst.msk [vmem:[#allocation2 + $0x40] sm:$0xff] %vm22_vm1, %v1205_v63  ;;  %442 = vperm.xlu1 %864, %v1205_v63   ;;  %457 = vperm.xlu0 %865, %v1202_v62  }
 0x179   :  { %v291_v2 = vpop.xlane.xlu1 %290  ;;  %v275_v3 = vpop.xlane.xlu0 %274 }
 0x17a   :  { %v1218_v4 = vmax.f32 %v1207_v0, %v291_v2  ;;  %v1221_v5 = vmax.f32 %v1209_v1, %v275_v3 }
 0x17c   :  { %602 = vst.msk [vmem:[#allocation2 + $0x48] sm:$0xff] %vm22_vm1, %v1218_v4  ;;  %594 = vst.msk [vmem:[#allocation2 + $0x8] sm:$0xff] %vm22_vm1, %v1221_v5  ;;  %417 = vperm.xlu1 %864, %v1186_v56   ;;  %447 = vperm.xlu0 %865, %v1218_v4  }
 0x17d   :  { %v287_v8 = vpop.xlane.xlu1 %286  ;;  %v285_v9 = vpop.xlane.xlu0 %284 }
 0x17e   :  { %v1234_v10 = vmax.f32 %v1223_v6, %v287_v8  ;;  %v1237_v11 = vmax.f32 %v1225_v7, %v285_v9 }
 0x180   :  { %600 = vst.msk [vmem:[#allocation2 + $0x38] sm:$0xff] %vm22_vm1, %v1234_v10  ;;  %599 = vst.msk [vmem:[#allocation2 + $0x30] sm:$0xff] %vm22_vm1, %v1237_v11  ;;  %407 = vperm.xlu1 %864, %v1221_v5  }
 0x181   :  { %v303_v16 = vpop.xlane.xlu1 %302  ;;  %v281_v17 = vpop.xlane.xlu0 %280 }
 0x182   :  { %v1249_v18 = vmax.f32 %v1239_v12, %v303_v16  ;;  %v1252_v19 = vmax.f32 %v1241_v15, %v281_v17 }
 0x184   :  { %608 = vst.msk [vmem:[#allocation2 + $0x78] sm:$0xff] %vm22_vm1, %v1249_v18  ;;  %597 = vst.msk [vmem:[#allocation2 + $0x20] sm:$0xff] %vm22_vm1, %v1252_v19  ;;  %432 = vperm.xlu1 %864, %v1237_v11  }
 0x185   :  { %v283_v24 = vpop.xlane.xlu1 %282  ;;  %v297_v27 = vpop.xlane.xlu0 %296 }
 0x186   :  { %v1264_v28 = vmax.f32 %v1254_v20, %v283_v24  ;;  %v1267_v29 = vmax.f32 %v1256_v23, %v297_v27 }
 0x188   :  { %598 = vst.msk [vmem:[#allocation2 + $0x28] sm:$0xff] %vm22_vm1, %v1264_v28  ;;  %605 = vst.msk [vmem:[#allocation2 + $0x60] sm:$0xff] %vm22_vm1, %v1267_v29  ;;  %422 = vperm.xlu1 %864, %v1252_v19  }
 0x189   :  { %v299_v32 = vpop.xlane.xlu1 %298  ;;  %v301_v33 = vpop.xlane.xlu0 %300 }
 0x18a   :  { %v1279_v40 = vmax.f32 %v1269_v30, %v299_v32  ;;  %v1282_v45 = vmax.f32 %v1271_v31, %v301_v33 }
 0x18c   :  { %606 = vst.msk [vmem:[#allocation2 + $0x68] sm:$0xff] %vm22_vm1, %v1279_v40  ;;  %607 = vst.msk [vmem:[#allocation2 + $0x70] sm:$0xff] %vm22_vm1, %v1282_v45  ;;  %462 = vperm.xlu1 %864, %v1267_v29   ;;  %467 = vperm.xlu0 %865, %v1279_v40  }
 0x190   :  { %437 = vperm.xlu1 %864, %v1234_v10   ;;  %477 = vperm.xlu0 %865, %v1249_v18  }
 0x194   :  { %427 = vperm.xlu1 %864, %v1264_v28  }
 0x198   :  { %472 = vperm.xlu1 %864, %v1282_v45  }
 0x1ef   :  { %v413_v48 = vpop.permute.xlu1 %412 }
 0x1f0   :  { %v482_v49 = vsub.f32 %v1071_v13, %v413_v48 }
 0x1f2   :  { %v500_v54 = vmul.f32 1.442695, %v482_v49 }
 0x1f3   :  { %v453_v55 = vpop.permute.xlu1 %452  ;;  %v403_v60 = vpop.permute.xlu0 %402 }
 0x1f4   :  { %876 = vpow2.f32 %v500_v54  ;;  %v490_v61 = vsub.f32 %v1074_v14, %v453_v55  ;;  %v480_v2 = vsub.f32 %v1079_v21, %v403_v60 }
 0x1f6   :  { %v516_v3 = vmul.f32 1.442695, %v490_v61  ;;  %v496_v8 = vmul.f32 1.442695, %v480_v2 }
 0x1f7   :  { %v443_v9 = vpop.permute.xlu1 %442  ;;  %v458_v16 = vpop.permute.xlu0 %457 }
 0x1f8   :  { %878 = vpow2.f32 %v516_v3  ;;  %v488_v17 = vsub.f32 %v1087_v25, %v443_v9  ;;  %v491_v27 = vsub.f32 %v1090_v26, %v458_v16 }
 0x1f9   :  { %880 = vpow2.f32 %v496_v8 }
 0x1fa   :  { %v512_v24 = vmul.f32 1.442695, %v488_v17  ;;  %v518_v55 = vmul.f32 1.442695, %v491_v27 }
 0x1fb   :  { %v418_v32 = vpop.permute.xlu1 %417  ;;  %v448_v48 = vpop.permute.xlu0 %447 }
 0x1fc   :  { %882 = vpow2.f32 %v512_v24  ;;  %v483_v33 = vsub.f32 %v1082_v22, %v418_v32  ;;  %v489_v60 = vsub.f32 %v1111_v34, %v448_v48 }
 0x1fe   :  { %v877_v49 = vpop.eup %876  ;;  %v502_v54 = vmul.f32 1.442695, %v483_v33  ;;  %v514_v16 = vmul.f32 1.442695, %v489_v60 }
 0x1ff   :  { %v408_v61 = vpop.permute.xlu1 %407  ;;  %532 = vadd.xlane.f32.xlu0 %v877_v49 }
 0x200   :  { %884 = vpow2.f32 %v502_v54  ;;  %v481_v2 = vsub.f32 %v1114_v35, %v408_v61 }
 0x201   :  { %886 = vpow2.f32 %v518_v55 }
 0x202   :  { %v879_v3 = vpop.eup %878  ;;  %v498_v8 = vmul.f32 1.442695, %v481_v2 }
 0x203   :  { %v881_v9 = vpop.eup %880  ;;  %v433_v17 = vpop.permute.xlu1 %432  ;;  %548 = vadd.xlane.f32.xlu0 %v879_v3 }
 0x204   :  { %888 = vpow2.f32 %v498_v8  ;;  %v486_v24 = vsub.f32 %v1117_v36, %v433_v17  ;;  %528 = vadd.xlane.f32.xlu1 %v881_v9 }
 0x205   :  { %890 = vpow2.f32 %v514_v16 }
 0x206   :  { %v883_v32 = vpop.eup %882  ;;  %v508_v27 = vmul.f32 1.442695, %v486_v24 }
 0x207   :  { %v423_v33 = vpop.permute.xlu1 %422  ;;  %544 = vadd.xlane.f32.xlu0 %v883_v32 }
 0x208   :  { %892 = vpow2.f32 %v508_v27  ;;  %v484_v48 = vsub.f32 %v1125_v38, %v423_v33 }
 0x20a   :  { %v885_v49 = vpop.eup %884  ;;  %v504_v54 = vmul.f32 1.442695, %v484_v48 }
 0x20b   :  { %v463_v61 = vpop.permute.xlu1 %462  ;;  %534 = vadd.xlane.f32.xlu1 %v885_v49  ;;  %v887_v60 = vpop.eup %886 }
 0x20c   :  { %894 = vpow2.f32 %v504_v54  ;;  %v492_v55 = vsub.f32 %v1133_v41, %v463_v61  ;;  %v468_v8 = vpop.permute.xlu0 %467 }
 0x20d   :  { %v493_v27 = vsub.f32 %v1144_v44, %v468_v8 }
 0x20e   :  { %v889_v2 = vpop.eup %888  ;;  %v520_v3 = vmul.f32 1.442695, %v492_v55 }
 0x20f   :  { %v438_v9 = vpop.permute.xlu1 %437  ;;  %530 = vadd.xlane.f32.xlu0 %v889_v2  ;;  %550 = vadd.xlane.f32.xlu1 %v887_v60  ;;  %v891_v17 = vpop.eup %890  ;;  %v522_v55 = vmul.f32 1.442695, %v493_v27 }
 0x210   :  { %896 = vpow2.f32 %v520_v3  ;;  %v487_v16 = vsub.f32 %v1122_v37, %v438_v9  ;;  %v478_v49 = vpop.permute.xlu0 %477 }
 0x211   :  { %v495_v60 = vsub.f32 %v1130_v39, %v478_v49  ;;  %v330_v49 = vsub.f32 %v1166_v46, %v1171_v50 }
 0x212   :  { %v893_v24 = vpop.eup %892  ;;  %v510_v32 = vmul.f32 1.442695, %v487_v16 }
 0x213   :  { %v428_v33 = vpop.permute.xlu1 %427  ;;  %540 = vadd.xlane.f32.xlu0 %v893_v24  ;;  %546 = vadd.xlane.f32.xlu1 %v891_v17  ;;  %v526_v8 = vmul.f32 1.442695, %v495_v60 }
 0x214   :  { %898 = vpow2.f32 %v510_v32  ;;  %v485_v48 = vsub.f32 %v1138_v42, %v428_v33 }
 0x216   :  { %v895_v54 = vpop.eup %894  ;;  %v506_v61 = vmul.f32 1.442695, %v485_v48  ;;  %v322_v48 = vsub.f32 %v1168_v47, %v1174_v51  ;;  %v331_v47 = vsub.f32 %v1191_v58, %v1202_v62  ;;  %v378_v58 = vld [vmem:[#allocation3 + $0x50] sm:$0xff] }
 0x217   :  { %v473_v2 = vpop.permute.xlu1 %472  ;;  %536 = vadd.xlane.f32.xlu0 %v895_v54 }
 0x218   :  { %900 = vpow2.f32 %v506_v61  ;;  %v494_v3 = vsub.f32 %v1141_v43, %v473_v2  ;;  %v340_v54 = vmul.f32 1.442695, %v322_v48  ;;  %v320_v61 = vsub.f32 %v1178_v53, %v1189_v57 }
 0x219   :  { %902 = vpow2.f32 %v522_v55  ;;  %v356_v55 = vmul.f32 1.442695, %v330_v49  ;;  %v328_v2 = vsub.f32 %v1193_v59, %v1205_v63  ;;  %v321_v53 = vsub.f32 %v1209_v1, %v1221_v5  ;;  %v368_v1 = vld [vmem:[#allocation3] sm:$0xff] }
 0x21a   :  { %v897_v9 = vpop.eup %896  ;;  %v524_v16 = vmul.f32 1.442695, %v494_v3  ;;  %v336_v60 = vmul.f32 1.442695, %v320_v61  ;;  %v323_v3 = vsub.f32 %v1176_v52, %v1186_v56  ;;  %v329_v59 = vsub.f32 %v1207_v0, %v1218_v4 }
 0x21b   :  { %552 = vadd.xlane.f32.xlu0 %v897_v9  ;;  %v352_v9 = vmul.f32 1.442695, %v328_v2  ;;  %v326_v52 = vsub.f32 %v1225_v7, %v1237_v11 }
 0x21c   :  { %904 = vpow2.f32 %v524_v16  ;;  %v342_v46 = vmul.f32 1.442695, %v323_v3  ;;  %v354_v49 = vmul.f32 1.442695, %v329_v59  ;;  %v376_v3 = vld [vmem:[#allocation3 + $0x40] sm:$0xff]  ;;  %v371_v59 = vld [vmem:[#allocation3 + $0x18] sm:$0xff] }
 0x21d   :  { %906 = vpow2.f32 %v526_v8  ;;  %v370_v8 = vld [vmem:[#allocation3 + $0x10] sm:$0xff]  ;;  %v348_v61 = vmul.f32 1.442695, %v326_v52  ;;  %v327_v52 = vsub.f32 %v1223_v6, %v1234_v10 }
 0x21e   :  { %v899_v17 = vpop.eup %898  ;;  %908 = vpow2.f32 %v340_v54 }
 0x21f   :  { %542 = vadd.xlane.f32.xlu1 %v899_v17  ;;  %910 = vpow2.f32 %v356_v55  ;;  %v358_v17 = vmul.f32 1.442695, %v331_v47  ;;  %v324_v55 = vsub.f32 %v1241_v15, %v1252_v19 }
 0x220   :  { %912 = vpow2.f32 %v336_v60 }
 0x221   :  { %914 = vpow2.f32 %v352_v9 }
 0x222   :  { %v901_v24 = vpop.eup %900  ;;  %916 = vpow2.f32 %v342_v46  ;;  %v344_v46 = vmul.f32 1.442695, %v324_v55  ;;  %v325_v55 = vsub.f32 %v1254_v20, %v1264_v28 }
 0x223   :  { %538 = vadd.xlane.f32.xlu1 %v901_v24  ;;  %v903_v32 = vpop.eup %902  ;;  %v338_v24 = vmul.f32 1.442695, %v321_v53  ;;  %918 = vpow2.f32 %v358_v17  ;;  %v332_v53 = vsub.f32 %v1256_v23, %v1267_v29 }
 0x225   :  { %920 = vpow2.f32 %v338_v24 }
 0x226   :  { %v905_v27 = vpop.eup %904 }
 0x227   :  { %556 = vadd.xlane.f32.xlu0 %v905_v27  ;;  %554 = vadd.xlane.f32.xlu1 %v903_v32  ;;  %v907_v33 = vpop.eup %906 }
 0x228   :  { %v909_v16 = vpop.eup %908 }
 0x229   :  { %v386_v32 = vmul.f32 %v909_v16, %v370_v8  ;;  %v911_v27 = vpop.eup %910 }
 0x22a   :  { %v913_v48 = vpop.eup %912  ;;  %v394_v0 = vmul.f32 %v911_v27, %v378_v58 }
 0x22b   :  { %558 = vadd.xlane.f32.xlu1 %v907_v33  ;;  %v915_v2 = vpop.eup %914  ;;  %v384_v7 = vmul.f32 %v913_v48, %v368_v1  ;;  %v379_v48 = vld [vmem:[#allocation3 + $0x58] sm:$0xff] }
 0x22c   :  { %v392_v15 = vmul.f32 %v915_v2, %v376_v3  ;;  %v917_v8 = vpop.eup %916 }
 0x22d   :  { %v919_v27 = vpop.eup %918  ;;  %v387_v23 = vmul.f32 %v917_v8, %v371_v59  ;;  %v346_v59 = vmul.f32 1.442695, %v325_v55  ;;  %v335_v55 = vsub.f32 %v1239_v12, %v1249_v18 }
 0x22e   :  { %v395_v2 = vmul.f32 %v919_v27, %v379_v48  ;;  %v372_v48 = vld [vmem:[#allocation3 + $0x20] sm:$0xff] }
 0x28c   :  { %v533_v33 = vpop.xlane.xlu0 %532 }
 0x28d   :  { %v562_v54 = vadd.f32 %v533_v33, %v386_v32  ;;  %v360_v32 = vmul.f32 1.442695, %v332_v53  ;;  %v921_v33 = vpop.eup %920  ;;  %v374_v53 = vld [vmem:[#allocation3 + $0x30] sm:$0xff] }
 0x28f   :  { %579 = vst.msk [vmem:[#allocation3 + $0x10] sm:$0xff] %vm22_vm1, %v562_v54  ;;  %922 = vlog2.f32 %v562_v54 }
 0x290   :  { %v549_v60 = vpop.xlane.xlu0 %548  ;;  %924 = vpow2.f32 %v354_v49  ;;  %v369_v49 = vld [vmem:[#allocation3 + $0x8] sm:$0xff] }
 0x291   :  { %v529_v9 = vpop.xlane.xlu1 %528  ;;  %v570_v47 = vadd.f32 %v549_v60, %v394_v0  ;;  %926 = vpow2.f32 %v348_v61  ;;  %v350_v61 = vmul.f32 1.442695, %v327_v52 }
 0x292   :  { %v560_v16 = vadd.f32 %v529_v9, %v384_v7  ;;  %v385_v7 = vmul.f32 %v921_v33, %v369_v49 }
 0x293   :  { %587 = vst.msk [vmem:[#allocation3 + $0x50] sm:$0xff] %vm22_vm1, %v570_v47  ;;  %928 = vlog2.f32 %v570_v47 }
 0x294   :  { %577 = vst.msk [vmem:[#allocation3] sm:$0xff] %vm22_vm1, %v560_v16  ;;  %930 = vlog2.f32 %v560_v16  ;;  %v545_v17 = vpop.xlane.xlu0 %544 }
 0x295   :  { %v568_v24 = vadd.f32 %v545_v17, %v392_v15  ;;  %932 = vpow2.f32 %v344_v46  ;;  %v377_v46 = vld [vmem:[#allocation3 + $0x48] sm:$0xff]  ;;  %v333_v15 = vsub.f32 %v1269_v30, %v1279_v40 }
 0x297   :  { %585 = vst.msk [vmem:[#allocation3 + $0x40] sm:$0xff] %vm22_vm1, %v568_v24  ;;  %934 = vlog2.f32 %v568_v24  ;;  %v334_v24 = vsub.f32 %v1271_v31, %v1282_v45  ;;  %v362_v49 = vmul.f32 1.442695, %v333_v15 }
 0x298   :  { %v535_v58 = vpop.xlane.xlu1 %534  ;;  %936 = vpow2.f32 %v360_v32 }
 0x299   :  { %v923_v54 = vpop.eup %922  ;;  %v563_v1 = vadd.f32 %v535_v58, %v387_v23 }
 0x29a   :  { %v614_v0 = vmul.f32 0.6931472, %v923_v54  ;;  %v925_v6 = vpop.eup %924 }
 0x29b   :  { %580 = vst.msk [vmem:[#allocation3 + $0x18] sm:$0xff] %vm22_vm1, %v563_v1  ;;  %938 = vlog2.f32 %v563_v1  ;;  %v927_v60 = vpop.eup %926 }
 0x29c   :  { %v551_v3 = vpop.xlane.xlu1 %550  ;;  %v531_v9 = vpop.xlane.xlu0 %530  ;;  %v643_v47 = vadd.f32 %v614_v0, %v1174_v51  ;;  %940 = vpow2.f32 %v350_v61  ;;  %v393_v51 = vmul.f32 %v925_v6, %v377_v46  ;;  %v390_v30 = vmul.f32 %v927_v60, %v374_v53 }
 0x29d   :  { %v929_v16 = vpop.eup %928  ;;  %v571_v20 = vadd.f32 %v551_v3, %v395_v2  ;;  %v561_v8 = vadd.f32 %v531_v9, %v385_v7  ;;  %v364_v0 = vmul.f32 1.442695, %v334_v24  ;;  %v380_v7 = vld [vmem:[#allocation3 + $0x60] sm:$0xff]  ;;  %v366_v9 = vmul.f32 1.442695, %v335_v55  ;;  %v381_v55 = vld [vmem:[#allocation3 + $0x68] sm:$0xff] }
 0x29e   :  { %v931_v17 = vpop.eup %930  ;;  %v630_v52 = vmul.f32 0.6931472, %v929_v16  ;;  %669 = vperm.xlu1 %864, %v643_v47   ;;  %771 = vst.msk [vmem:[#allocation4 + $0x10] sm:$0xff] %vm22_vm1, %v643_v47 }
 0x29f   :  { %v610_v32 = vmul.f32 0.6931472, %v931_v17  ;;  %588 = vst.msk [vmem:[#allocation3 + $0x58] sm:$0xff] %vm22_vm1, %v571_v20  ;;  %942 = vlog2.f32 %v571_v20  ;;  %578 = vst.msk [vmem:[#allocation3 + $0x8] sm:$0xff] %vm22_vm1, %v561_v8  ;;  %v933_v27 = vpop.eup %932  ;;  %v375_v20 = vld [vmem:[#allocation3 + $0x38] sm:$0xff] }
 0x2a0   :  { %944 = vlog2.f32 %v561_v8  ;;  %v547_v23 = vpop.xlane.xlu1 %546  ;;  %v541_v33 = vpop.xlane.xlu0 %540  ;;  %v651_v58 = vadd.f32 %v630_v52, %v1171_v50  ;;  %v388_v50 = vmul.f32 %v933_v27, %v372_v48  ;;  %v373_v27 = vld [vmem:[#allocation3 + $0x28] sm:$0xff] }
 0x2a1   :  { %v935_v31 = vpop.eup %934  ;;  %v569_v54 = vadd.f32 %v547_v23, %v393_v51  ;;  %v566_v1 = vadd.f32 %v541_v33, %v390_v30  ;;  %v641_v61 = vadd.f32 %v610_v32, %v1189_v57  ;;  %946 = vpow2.f32 %v346_v59 }
 0x2a2   :  { %v626_v6 = vmul.f32 0.6931472, %v935_v31  ;;  %709 = vperm.xlu1 %864, %v651_v58   ;;  %779 = vst.msk [vmem:[#allocation4 + $0x50] sm:$0xff] %vm22_vm1, %v651_v58  ;;  %v937_v2 = vpop.eup %936 }
 0x2a3   :  { %586 = vst.msk [vmem:[#allocation3 + $0x48] sm:$0xff] %vm22_vm1, %v569_v54  ;;  %948 = vlog2.f32 %v569_v54  ;;  %583 = vst.msk [vmem:[#allocation3 + $0x30] sm:$0xff] %vm22_vm1, %v566_v1  ;;  %659 = vperm.xlu0 %865, %v641_v61   ;;  %v396_v46 = vmul.f32 %v937_v2, %v380_v7 }
 0x2a4   :  { %769 = vst.msk [vmem:[#allocation4] sm:$0xff] %vm22_vm1, %v641_v61  ;;  %950 = vlog2.f32 %v566_v1  ;;  %v537_v57 = vpop.xlane.xlu0 %536  ;;  %v649_v12 = vadd.f32 %v626_v6, %v1205_v63 }
 0x2a5   :  { %v939_v60 = vpop.eup %938  ;;  %952 = vpow2.f32 %v362_v49  ;;  %v564_v3 = vadd.f32 %v537_v57, %v388_v50 }
 0x2a6   :  { %954 = vpow2.f32 %v364_v0  ;;  %v616_v47 = vmul.f32 0.6931472, %v939_v60  ;;  %699 = vperm.xlu1 %864, %v649_v12   ;;  %777 = vst.msk [vmem:[#allocation4 + $0x40] sm:$0xff] %vm22_vm1, %v649_v12  ;;  %v941_v53 = vpop.eup %940 }
 0x2a7   :  { %581 = vst.msk [vmem:[#allocation3 + $0x20] sm:$0xff] %vm22_vm1, %v564_v3  ;;  %956 = vlog2.f32 %v564_v3  ;;  %v391_v52 = vmul.f32 %v941_v53, %v375_v20 }
 0x2a8   :  { %v553_v16 = vpop.xlane.xlu0 %552  ;;  %v644_v15 = vadd.f32 %v616_v47, %v1186_v56  ;;  %958 = vpow2.f32 %v366_v9  ;;  %v383_v9 = vld [vmem:[#allocation3 + $0x78] sm:$0xff] }
 0x2a9   :  { %v943_v63 = vpop.eup %942  ;;  %v572_v8 = vadd.f32 %v553_v16, %v396_v46 }
 0x2aa   :  { %v945_v17 = vpop.eup %944  ;;  %v632_v59 = vmul.f32 0.6931472, %v943_v63  ;;  %772 = vst.msk [vmem:[#allocation4 + $0x18] sm:$0xff] %vm22_vm1, %v644_v15  ;;  %674 = vperm.xlu0 %865, %v644_v15  }
 0x2ab   :  { %v612_v24 = vmul.f32 0.6931472, %v945_v17  ;;  %589 = vst.msk [vmem:[#allocation3 + $0x60] sm:$0xff] %vm22_vm1, %v572_v8  ;;  %960 = vlog2.f32 %v572_v8  ;;  %v947_v32 = vpop.eup %946 }
 0x2ac   :  { %v543_v51 = vpop.xlane.xlu1 %542  ;;  %v652_v30 = vadd.f32 %v632_v59, %v1202_v62  ;;  %v389_v54 = vmul.f32 %v947_v32, %v373_v27 }
 0x2ad   :  { %v949_v56 = vpop.eup %948  ;;  %v567_v23 = vadd.f32 %v543_v51, %v391_v52  ;;  %v642_v33 = vadd.f32 %v612_v24, %v1221_v5  ;;  %v382_v5 = vld [vmem:[#allocation3 + $0x70] sm:$0xff] }
 0x2ae   :  { %v951_v58 = vpop.eup %950  ;;  %v628_v48 = vmul.f32 0.6931472, %v949_v56  ;;  %780 = vst.msk [vmem:[#allocation4 + $0x58] sm:$0xff] %vm22_vm1, %v652_v30  ;;  %714 = vperm.xlu0 %865, %v652_v30  }
 0x2af   :  { %v953_v31 = vpop.eup %952  ;;  %v622_v49 = vmul.f32 0.6931472, %v951_v58  ;;  %584 = vst.msk [vmem:[#allocation3 + $0x38] sm:$0xff] %vm22_vm1, %v567_v23  ;;  %962 = vlog2.f32 %v567_v23  ;;  %664 = vperm.xlu1 %864, %v642_v33   ;;  %770 = vst.msk [vmem:[#allocation4 + $0x8] sm:$0xff] %vm22_vm1, %v642_v33 }
 0x2b0   :  { %v955_v62 = vpop.eup %954  ;;  %v539_v1 = vpop.xlane.xlu1 %538  ;;  %v650_v61 = vadd.f32 %v628_v48, %v1218_v4  ;;  %v397_v57 = vmul.f32 %v953_v31, %v381_v55 }
 0x2b1   :  { %v957_v0 = vpop.eup %956  ;;  %v565_v6 = vadd.f32 %v539_v1, %v389_v54  ;;  %v647_v50 = vadd.f32 %v622_v49, %v1237_v11  ;;  %v398_v12 = vmul.f32 %v955_v62, %v382_v5 }
 0x2b2   :  { %v618_v2 = vmul.f32 0.6931472, %v957_v0  ;;  %778 = vst.msk [vmem:[#allocation4 + $0x48] sm:$0xff] %vm22_vm1, %v650_v61  ;;  %704 = vperm.xlu0 %865, %v650_v61   ;;  %v959_v7 = vpop.eup %958 }
 0x2b3   :  { %582 = vst.msk [vmem:[#allocation3 + $0x28] sm:$0xff] %vm22_vm1, %v565_v6  ;;  %964 = vlog2.f32 %v565_v6  ;;  %689 = vperm.xlu1 %864, %v647_v50   ;;  %775 = vst.msk [vmem:[#allocation4 + $0x30] sm:$0xff] %vm22_vm1, %v647_v50  ;;  %v399_v16 = vmul.f32 %v959_v7, %v383_v9 }
 0x2b4   :  { %v555_v4 = vpop.xlane.xlu1 %554  ;;  %v557_v60 = vpop.xlane.xlu0 %556  ;;  %v645_v3 = vadd.f32 %v618_v2, %v1252_v19 }
 0x2b5   :  { %v961_v47 = vpop.eup %960  ;;  %v573_v11 = vadd.f32 %v555_v4, %v397_v57  ;;  %v574_v46 = vadd.f32 %v557_v60, %v398_v12 }
 0x2b6   :  { %v634_v53 = vmul.f32 0.6931472, %v961_v47  ;;  %773 = vst.msk [vmem:[#allocation4 + $0x20] sm:$0xff] %vm22_vm1, %v645_v3 }
 0x2b7   :  { %590 = vst.msk [vmem:[#allocation3 + $0x68] sm:$0xff] %vm22_vm1, %v573_v11  ;;  %966 = vlog2.f32 %v573_v11  ;;  %591 = vst.msk [vmem:[#allocation3 + $0x70] sm:$0xff] %vm22_vm1, %v574_v46  ;;  %679 = vperm.xlu1 %864, %v645_v3  }
 0x2b8   :  { %968 = vlog2.f32 %v574_v46  ;;  %v559_v15 = vpop.xlane.xlu1 %558  ;;  %v653_v20 = vadd.f32 %v634_v53, %v1267_v29 }
 0x2b9   :  { %v963_v63 = vpop.eup %962  ;;  %v575_v19 = vadd.f32 %v559_v15, %v399_v16 }
 0x2ba   :  { %v624_v8 = vmul.f32 0.6931472, %v963_v63  ;;  %781 = vst.msk [vmem:[#allocation4 + $0x60] sm:$0xff] %vm22_vm1, %v653_v20 }
 0x2bb   :  { %592 = vst.msk [vmem:[#allocation3 + $0x78] sm:$0xff] %vm22_vm1, %v575_v19  ;;  %970 = vlog2.f32 %v575_v19  ;;  %719 = vperm.xlu1 %864, %v653_v20  }
 0x2bc   :  { %v648_v17 = vadd.f32 %v624_v8, %v1234_v10 }
 0x2bd   :  { %v965_v59 = vpop.eup %964 }
 0x2be   :  { %v620_v24 = vmul.f32 0.6931472, %v965_v59  ;;  %776 = vst.msk [vmem:[#allocation4 + $0x38] sm:$0xff] %vm22_vm1, %v648_v17  ;;  %694 = vperm.xlu0 %865, %v648_v17  }
 0x2c0   :  { %v646_v52 = vadd.f32 %v620_v24, %v1264_v28 }
 0x2c1   :  { %v967_v32 = vpop.eup %966 }
 0x2c2   :  { %v969_v29 = vpop.eup %968  ;;  %v636_v51 = vmul.f32 0.6931472, %v967_v32  ;;  %774 = vst.msk [vmem:[#allocation4 + $0x28] sm:$0xff] %vm22_vm1, %v646_v52  ;;  %684 = vperm.xlu0 %865, %v646_v52  }
 0x2c3   :  { %v638_v30 = vmul.f32 0.6931472, %v969_v29 }
 0x2c4   :  { %v654_v27 = vadd.f32 %v636_v51, %v1279_v40 }
 0x2c5   :  { %v971_v56 = vpop.eup %970  ;;  %v655_v23 = vadd.f32 %v638_v30, %v1282_v45 }
 0x2c6   :  { %v640_v10 = vmul.f32 0.6931472, %v971_v56  ;;  %782 = vst.msk [vmem:[#allocation4 + $0x68] sm:$0xff] %vm22_vm1, %v654_v27  ;;  %724 = vperm.xlu0 %865, %v654_v27  }
 0x2c7   :  { %729 = vperm.xlu1 %864, %v655_v23   ;;  %783 = vst.msk [vmem:[#allocation4 + $0x70] sm:$0xff] %vm22_vm1, %v655_v23 }
 0x2c8   :  { %v656_v28 = vadd.f32 %v640_v10, %v1249_v18 }
 0x2ca   :  { %784 = vst.msk [vmem:[#allocation4 + $0x78] sm:$0xff] %vm22_vm1, %v656_v28  ;;  %734 = vperm.xlu0 %865, %v656_v28  }
 0x2cb   :  { %983 = shalt.err (!%p980_p4)
}
 0x2cc   :  { %s984_s13 = scalar_lea.hbm %s1470_s4, 2048 }
 0x2cd   :  { %p985_p5 = scmp.ne.s32.totalorder %s1470_s4, %s984_s13  ;;  %p988_p6 = scmp.lt.u32.totalorder %s984_s13, %s1470_s4 }
 0x2cf   :  { %p990_p7 = pnand %p988_p6, %p985_p5 }
 0x2d1   :  { %993 = shalt.err (!%p990_p7)
}
 0x2d2   :  { %s1000_s18 = smov 128   ;;  %s1001_s19 = smov 8  }
 0x2d3   :  { %798 = dma.vmem_to_hbm [thread:$0]  %s793_s2, 2048, %s1470_s4, [#allocation5], %s1000_s18, %s1000_s18, %s1001_s19  }
 0x31d   :  { %v670_v18 = vpop.permute.xlu1 %669 }
 0x31e   :  { %v739_v40 = vsub.f32 %v1071_v13, %v670_v18 }
 0x320   :  { %755 = vst [vmem:[%s1469_s3 + $0x10] sm:$0xff] %v739_v40 }
 0x321   :  { %v710_v45 = vpop.permute.xlu1 %709 }
 0x322   :  { %v747_v33 = vsub.f32 %v1074_v14, %v710_v45  ;;  %v660_v58 = vpop.permute.xlu0 %659 }
 0x323   :  { %v737_v48 = vsub.f32 %v1079_v21, %v660_v58 }
 0x324   :  { %763 = vst [vmem:[%s1469_s3 + $0x50] sm:$0xff] %v747_v33 }
 0x325   :  { %753 = vst [vmem:[%s1469_s3] sm:$0xff] %v737_v48  ;;  %v700_v31 = vpop.permute.xlu1 %699 }
 0x326   :  { %v745_v13 = vsub.f32 %v1087_v25, %v700_v31 }
 0x328   :  { %761 = vst [vmem:[%s1469_s3 + $0x40] sm:$0xff] %v745_v13 }
 0x329   :  { %v675_v49 = vpop.permute.xlu0 %674 }
 0x32a   :  { %v740_v14 = vsub.f32 %v1082_v22, %v675_v49 }
 0x32c   :  { %756 = vst [vmem:[%s1469_s3 + $0x18] sm:$0xff] %v740_v14 }
 0x32d   :  { %v715_v21 = vpop.permute.xlu0 %714 }
 0x32e   :  { %v665_v54 = vpop.permute.xlu1 %664  ;;  %v748_v62 = vsub.f32 %v1090_v26, %v715_v21 }
 0x32f   :  { %v738_v1 = vsub.f32 %v1114_v35, %v665_v54 }
 0x330   :  { %764 = vst [vmem:[%s1469_s3 + $0x58] sm:$0xff] %v748_v62 }
 0x331   :  { %754 = vst [vmem:[%s1469_s3 + $0x8] sm:$0xff] %v738_v1  ;;  %v705_v25 = vpop.permute.xlu0 %704 }
 0x332   :  { %v690_v22 = vpop.permute.xlu1 %689  ;;  %v746_v61 = vsub.f32 %v1111_v34, %v705_v25 }
 0x333   :  { %v743_v55 = vsub.f32 %v1117_v36, %v690_v22 }
 0x334   :  { %762 = vst [vmem:[%s1469_s3 + $0x48] sm:$0xff] %v746_v61 }
 0x335   :  { %759 = vst [vmem:[%s1469_s3 + $0x30] sm:$0xff] %v743_v55 }
 0x336   :  { %v680_v26 = vpop.permute.xlu1 %679 }
 0x337   :  { %v741_v35 = vsub.f32 %v1125_v38, %v680_v26 }
 0x339   :  { %757 = vst [vmem:[%s1469_s3 + $0x20] sm:$0xff] %v741_v35 }
 0x33a   :  { %v720_v5 = vpop.permute.xlu1 %719 }
 0x33b   :  { %v749_v34 = vsub.f32 %v1133_v41, %v720_v5 }
 0x33d   :  { %765 = vst [vmem:[%s1469_s3 + $0x60] sm:$0xff] %v749_v34  ;;  %v695_v36 = vpop.permute.xlu0 %694 }
 0x33e   :  { %v744_v0 = vsub.f32 %v1122_v37, %v695_v36 }
 0x340   :  { %760 = vst [vmem:[%s1469_s3 + $0x38] sm:$0xff] %v744_v0 }
 0x341   :  { %v685_v6 = vpop.permute.xlu0 %684 }
 0x342   :  { %v742_v38 = vsub.f32 %v1138_v42, %v685_v6 }
 0x344   :  { %758 = vst [vmem:[%s1469_s3 + $0x28] sm:$0xff] %v742_v38 }
 0x345   :  { %v725_v50 = vpop.permute.xlu0 %724 }
 0x346   :  { %v730_v41 = vpop.permute.xlu1 %729  ;;  %v750_v2 = vsub.f32 %v1144_v44, %v725_v50 }
 0x347   :  { %v751_v57 = vsub.f32 %v1141_v43, %v730_v41 }
 0x348   :  { %766 = vst [vmem:[%s1469_s3 + $0x68] sm:$0xff] %v750_v2 }
 0x349   :  { %767 = vst [vmem:[%s1469_s3 + $0x70] sm:$0xff] %v751_v57  ;;  %v735_v37 = vpop.permute.xlu0 %734 }
 0x34a   :  { %v752_v42 = vsub.f32 %v1130_v39, %v735_v37 }
 0x34c   :  { %768 = vst [vmem:[%s1469_s3 + $0x78] sm:$0xff] %v752_v42 }
 0x34d   :  { %994 = dma.done.wait [#allocation5], 2048  }
 0x34e   :  { %995 = vsyncadd [#allocation5], 4294965248 }
 0x34f   :  { %804 = vsyncpa [#allocation5], 1 }

</bundles_post_ra>
